<compile_context>
chip_gen: v7x
topology: tpu7x:2x2x1
jax: 0.10.0
libtpu: 0.0.40
codegen_flags: <defaults>
</compile_context>

<pallas_src>
import functools

import jax
import jax.numpy as jnp
from jax.experimental import pallas as pl
from jax.experimental.pallas import tpu as pltpu


_LANE = 512                       # lane-dense last dim for the flattened path
_ROW_ALIGN = 32                   # row-block alignment (covers f32 (8,.) and bf16 (16,.))
_MAX_BLOCK_ROWS = 1024            # 1024 x 512 x 4 B = 2 MiB f32 per input block
_TARGET_BLOCK_BYTES = 4 * 1024 * 1024   # per-block input budget (direct path)
_PAD_LOGIT = -40.0                # sigmoid(-40) == 0.0 exactly in f32 -> unit == 0 exactly
_VMEM_LIMIT = 32 * 1024 * 1024    # raise v5e's 16 MiB default; no-op on v6e/v7x


def _cdiv(a, b):
    return -(-a // b)


def _round_up(x, m):
    return _cdiv(x, m) * m


def _sigmoid(x):
    # Explicit tanh form: guaranteed single EUP transcendental (vs exp+recip).
    return 0.5 * jnp.tanh(0.5 * x) + 0.5


def _pow_static(x, gamma):
    """x**gamma with a repeated-multiply fast path for small integer gamma."""
    g = float(gamma)
    if g.is_integer() and 0 <= int(g) <= 8:
        gi = int(g)
        if gi == 0:
            return jnp.ones_like(x)
        y = x
        for _ in range(gi - 1):
            y = y * x
        return y
    return jnp.power(x, jnp.float32(g))


def _neg_focal_kernel(pred_ref, out_ref, *, gamma, eps, rows_total, block_rows):
    """Per-block partial sum of the background-formula focal term.

    unit(x) = sigmoid(x)^gamma * log(min(1 - sigmoid(x) + eps, 1))  (<= 0)
    out[0, :] = sum over this block's valid rows of unit(x).
    """
    x = pred_ref[...].astype(jnp.float32)                       # (block_rows, C)
    p = _sigmoid(x)                                             # 1 EUP (tanh)
    w = _pow_static(p, gamma)                                   # VPU for int gamma
    log_term = jnp.log(jnp.minimum((1.0 - p) + jnp.float32(eps), 1.0))   # 1 EUP
    unit = w * log_term                                         # <= 0

    if rows_total % block_rows != 0:
        # Ragged last block (direct-layout path): zero rows past the true end.
        row0 = pl.program_id(0) * block_rows
        rid = jax.lax.broadcasted_iota(jnp.int32, unit.shape, 0)
        unit = jnp.where(rid + row0 < rows_total, unit, 0.0)

    out_ref[...] = jnp.sum(unit, axis=0, keepdims=True)         # (1, C) partial


def _neg_partial_sums(arr, rows_total, block_rows, *, gamma, eps):
    """Run the kernel over a (R, C) array; returns (num_blocks, C) f32 partials."""
    _, C = arr.shape
    num_blocks = _cdiv(rows_total, block_rows)
    kernel = functools.partial(
        _neg_focal_kernel, gamma=float(gamma), eps=float(eps),
        rows_total=int(rows_total), block_rows=int(block_rows))
    elems = int(rows_total) * int(C)
    cost = pl.CostEstimate(
        flops=8 * elems,
        transcendentals=2 * elems,
        bytes_accessed=int(arr.size) * arr.dtype.itemsize + num_blocks * C * 4)
    return pl.pallas_call(
        kernel,
        out_shape=jax.ShapeDtypeStruct((num_blocks, C), jnp.float32),
        grid_spec=pltpu.PrefetchScalarGridSpec(
            num_scalar_prefetch=0,
            grid=(num_blocks,),
            in_specs=[pl.BlockSpec((block_rows, C), lambda i: (i, 0))],
            out_specs=pl.BlockSpec((1, C), lambda i: (i, 0)),
        ),
        compiler_params=pltpu.CompilerParams(
            dimension_semantics=("parallel",),
            vmem_limit_bytes=_VMEM_LIMIT),
        cost_estimate=cost,
    )(arr)


def focal_loss(pred, target, *, num_classes, alpha=0.25, gamma=2.0,
               loss_weight=1.0, eps=1e-12, reduction="mean",
               loss_name="cls_loss"):
    """Pallas implementation of FocalLoss.forward (weight=None, avg_factor=None).

    pred:   (N, num_classes - 1) float (f32 or bf16)
    target: (N,) int, values in [0, num_classes-1]; negatives -> background.
    """
    N, c_fg = pred.shape
    assert c_fg == num_classes - 1

    # ---- choose input layout for the kernel ---------------------------------
    if c_fg % 128 == 0 and N >= _ROW_ALIGN:
        # Direct path: consume the producer's (N, Cfg) layout, zero relayout.
        C = c_fg
        tgt_rows = max(_ROW_ALIGN,
                       (_TARGET_BLOCK_BYTES // max(1, C * pred.dtype.itemsize))
                       // _ROW_ALIGN * _ROW_ALIGN)
        block_rows = min(_MAX_BLOCK_ROWS, tgt_rows, (N // _ROW_ALIGN) * _ROW_ALIGN)
        arr = pred
        rows_total = N
    else:
        # Lane-dense flatten: single materialized relayout pass over pred only.
        # Padded logits of -40 give sigmoid == 0 exactly in f32, so the padded
        # elements contribute exactly zero loss for any eps and any gamma >= 0.
        total = N * c_fg
        rows = _cdiv(total, _LANE)
        block_rows = min(_MAX_BLOCK_ROWS, _round_up(rows, _ROW_ALIGN))
        num_blocks = _cdiv(rows, block_rows)
        rows_padded = num_blocks * block_rows
        pad_amt = rows_padded * _LANE - total
        flat = jnp.pad(pred.reshape(-1), (0, pad_amt),
                       constant_values=jnp.asarray(_PAD_LOGIT, pred.dtype))
        arr = flat.reshape(rows_padded, _LANE)
        rows_total = rows_padded

    # ---- kernel: background-formula partial sums -----------------------------
    partials = _neg_partial_sums(arr, rows_total, block_rows, gamma=gamma, eps=eps)
    neg_unit_sum = jnp.sum(partials)                 # sum of p^g * log(min(1-p+eps,1))
    total_neg = -(1.0 - alpha) * neg_unit_sum        # as if every element were background

    # ---- O(N) sparse positive correction in plain JAX ------------------------
    t = jnp.where(target < 0, num_classes - 1, target).astype(jnp.int32)
    fg = t < c_fg                                    # anchors with a foreground class
    idx = jnp.where(fg, t, 0)
    x_fg = jnp.take_along_axis(pred, idx[:, None], axis=1)[:, 0].astype(jnp.float32)
    p = _sigmoid(x_fg)
    pos_term = -alpha * _pow_static(1.0 - p, gamma) * jnp.log(jnp.minimum(p + eps, 1.0))
    neg_term = (-(1.0 - alpha) * _pow_static(p, gamma)
                * jnp.log(jnp.minimum((1.0 - p) + eps, 1.0)))   # what the kernel counted
    correction = jnp.sum(jnp.where(fg, pos_term - neg_term, 0.0))

    total_sum = total_neg + correction

    if reduction == "mean":
        loss = total_sum / jnp.float32(N * c_fg)
    elif reduction == "sum":
        loss = total_sum
    else:
        # TODO(synk): reduction='none' would return the full (N, Cfg) loss map;
        # only mean/sum reductions are fused here.
        raise NotImplementedError("only 'mean' and 'sum' reductions are fused")

    # TODO(synk): weight / avg_factor / points_per_strides / valid_classes_list
    # paths not implemented (they default to None in the reference forward).

    loss = loss * jnp.float32(loss_weight)
    if loss_name is None:
        return loss
    return {loss_name: loss}


def _reference(pred, target, *, num_classes, alpha, gamma, eps, loss_weight):
    p = jax.nn.sigmoid(pred.astype(jnp.float32))
    t = jnp.where(target < 0, num_classes - 1, target)
    oh = jax.nn.one_hot(t, num_classes)[..., : num_classes - 1]
    pos = oh == 1
    pt = jnp.where(pos, p, 1 - p)
    at = jnp.where(pos, alpha, 1 - alpha)
    loss = -at * jnp.power(1 - pt, gamma) * jnp.log(jnp.minimum(pt + eps, 1.0))
    return jnp.mean(loss) * loss_weight


if __name__ == "__main__":
    key = jax.random.PRNGKey(0)
    k1, k2, k3, k4 = jax.random.split(key, 4)

    # ---- case 1: detection-style head, Cfg = 7 -> lane-dense flatten path ----
    NUM_CLASSES = 8          # including background -> 7 foreground classes
    N = 256
    pred = jax.random.normal(k1, (N, NUM_CLASSES - 1), dtype=jnp.float32)
    target = jax.random.randint(k2, (N,), -1, NUM_CLASSES, dtype=jnp.int32)

    out = focal_loss(pred, target, num_classes=NUM_CLASSES)
    got = jax.block_until_ready(out["cls_loss"])
    want = _reference(pred, target, num_classes=NUM_CLASSES, alpha=0.25,
                      gamma=2.0, eps=1e-12, loss_weight=1.0)
    assert jnp.allclose(got, want, rtol=1e-4, atol=1e-6), ("flatten/f32", got, want)

    # ---- case 2: same data as bf16 (halved HBM stream into the kernel) -------
    pred_bf16 = pred.astype(jnp.bfloat16)
    out = focal_loss(pred_bf16, target, num_classes=NUM_CLASSES)
    got = jax.block_until_ready(out["cls_loss"])
    want = _reference(pred_bf16, target, num_classes=NUM_CLASSES, alpha=0.25,
                      gamma=2.0, eps=1e-12, loss_weight=1.0)
    assert jnp.allclose(got, want, rtol=1e-4, atol=1e-6), ("flatten/bf16", got, want)

    # ---- case 3: Cfg = 128 -> direct (no-relayout) path with a ragged edge ---
    NUM_CLASSES2 = 129
    N2 = 200                                  # not a multiple of the row block
    pred2 = jax.random.normal(k3, (N2, NUM_CLASSES2 - 1), dtype=jnp.float32)
    target2 = jax.random.randint(k4, (N2,), -1, NUM_CLASSES2, dtype=jnp.int32)

    out2 = focal_loss(pred2, target2, num_classes=NUM_CLASSES2, alpha=0.3,
                      gamma=2.0, loss_weight=0.5)
    got2 = jax.block_until_ready(out2["cls_loss"])
    want2 = _reference(pred2, target2, num_classes=NUM_CLASSES2, alpha=0.3,
                       gamma=2.0, eps=1e-12, loss_weight=0.5)
    assert jnp.allclose(got2, want2, rtol=1e-4, atol=1e-6), ("direct/f32", got2, want2)

    print("KERNEL_OK")
</pallas_src>

<mosaic_0001>
module attributes {stable_mosaic.version = 11 : i64} {
  func.func @_neg_focal_kernel(%arg0: i32, %arg1: memref<32x512xf32, #tpu.memory_space<vmem>>, %arg2: memref<1x512xf32, #tpu.memory_space<vmem>>) attributes {dimension_semantics = [#tpu.dimension_semantics<parallel>], iteration_bounds = array<i64: 1>, scalar_prefetch = 0 : i64, scratch_operands = 0 : i64, tpu.core_type = #tpu.core_type<tc>, window_params = [{transform_indices = @transform_0, window_bounds = array<i64: 32, 512>}, {transform_indices = @transform_1, window_bounds = array<i64: 1, 512>}]} {
    %c0 = arith.constant 0 : index
    %c0_0 = arith.constant 0 : index
    %0 = vector.load %arg1[%c0, %c0_0] : memref<32x512xf32, #tpu.memory_space<vmem>>, vector<32x512xf32>
    %cst = arith.constant 5.000000e-01 : f32
    %1 = vector.broadcast %cst : f32 to vector<32x512xf32>
    %2 = arith.mulf %1, %0 : vector<32x512xf32>
    %3 = math.tanh %2 : vector<32x512xf32>
    %cst_1 = arith.constant 5.000000e-01 : f32
    %4 = vector.broadcast %cst_1 : f32 to vector<32x512xf32>
    %5 = arith.mulf %4, %3 : vector<32x512xf32>
    %cst_2 = arith.constant 5.000000e-01 : f32
    %6 = vector.broadcast %cst_2 : f32 to vector<32x512xf32>
    %7 = arith.addf %5, %6 : vector<32x512xf32>
    %8 = arith.mulf %7, %7 : vector<32x512xf32>
    %cst_3 = arith.constant 1.000000e+00 : f32
    %9 = vector.broadcast %cst_3 : f32 to vector<32x512xf32>
    %10 = arith.subf %9, %7 : vector<32x512xf32>
    %cst_4 = arith.constant 9.99999996E-13 : f32
    %11 = vector.broadcast %cst_4 : f32 to vector<32x512xf32>
    %12 = arith.addf %10, %11 : vector<32x512xf32>
    %cst_5 = arith.constant 1.000000e+00 : f32
    %13 = vector.broadcast %cst_5 : f32 to vector<32x512xf32>
    %14 = arith.minimumf %12, %13 : vector<32x512xf32>
    %15 = math.log %14 : vector<32x512xf32>
    %16 = arith.mulf %8, %15 : vector<32x512xf32>
    %cst_6 = arith.constant dense<0.000000e+00> : vector<512xf32>
    %17 = vector.multi_reduction <add>, %16, %cst_6 [0] : vector<32x512xf32> to vector<512xf32>
    %18 = vector.shape_cast %17 : vector<512xf32> to vector<1x512xf32>
    %c0_7 = arith.constant 0 : index
    %c0_8 = arith.constant 0 : index
    %19 = vector.load %arg2[%c0_7, %c0_8] : memref<1x512xf32, #tpu.memory_space<vmem>>, vector<1x512xf32>
    tpu.vector_store %arg2[%c0_7, %c0_8], %18 {strides = array<i32>} : memref<1x512xf32, #tpu.memory_space<vmem>>, vector<1x512xf32>,
    return
  }
  func.func @transform_0(%arg0: i32) -> (i32, i32) {
    %c0_i32 = arith.constant 0 : i32
    %c0_i32_0 = arith.constant 0 : i32
    return %arg0, %c0_i32 : i32, i32
  }
  func.func @transform_1(%arg0: i32) -> (i32, i32) {
    %c0_i32 = arith.constant 0 : i32
    %c0_i32_0 = arith.constant 0 : i32
    return %arg0, %c0_i32 : i32, i32
  }
}

</mosaic_0001>

<bundles_post_ra>
// kernel: tpu_custom_call.1
= control target key start
LH: loop header
LB: loop body
LE: loop exit
PB: predicated region body
PF: predicated region fallthrough
CT: control target
= control target key end

     0   :  { %6 = vsyncpa [#allocation3], 0  ;;  %s536_s0 = inlined_call_operand.hbm [shape: f32[32,512], index: 0, kind: input, shape index: {}]   ;;  %s537_s1 = inlined_call_operand.hbm [shape: f32[1,512], index: 1, kind: output, shape index: {}]  }
   0x1   :  { %7 = vsyncpa [#allocation4], 0  ;;  %s417_s6 = smov [#allocation2]   ;;  %s369_s10 = scalar_lea.hbm %s536_s0, 2048 }
   0x2   :  { %s13_s7 = sshll.u32 %s417_s6, 4  ;;  %p370_p0 = scmp.ne.s32.totalorder %s536_s0, %s369_s10  ;;  %s14_s7 = int_to_ptr.vmem [resolvable:$true] %s13_s7 }
   0x3   :  { %p373_p1 = scmp.lt.u32.totalorder %s369_s10, %s536_s0 }
   0x5   :  { %p375_p2 = pnand %p373_p1, %p370_p0 }
   0x7   :  { %378 = shalt.err (!%p375_p2)
}
   0x8   :  { %s379_s15 = scalar_lea.vmem %s14_s7, 2048  ;;  %p384_p4 = scmp.lt.s32.totalorder %s14_s7, %s14_s7 }
   0x9   :  { %p380_p3 = scmp.ne.s32.totalorder %s14_s7, %s379_s15  ;;  %p385_p5 = scmp.lt.s32.totalorder %s379_s15, %s379_s15 }
   0xb   :  { %p386_p6 = por %p385_p5, %p384_p4 }
   0xd   :  { %p387_p7 = pnand %p386_p6, %p380_p3 }
   0xf   :  { %390 = shalt.err (!%p387_p7)
}
  0x10   :  { %s418_s16 = smov 512   ;;  %s419_s17 = smov 32  }
  0x11   :  { %19 = dma.hbm_to_vmem [thread:$0]  %s536_s0, 2048, %s14_s7, [#allocation3], %s418_s16, %s418_s16, %s419_s17  }
  0x12   :  { %413 = dma.done.wait [#allocation3], 2048  }
  0x13   :  { %414 = vsyncadd [#allocation3], 4294965248  ;;  %v23_v0 = vld [vmem:[#allocation2] sm:$0xff]  ;;  %v24_v1 = vld [vmem:[#allocation2 + $0x8] sm:$0xff]  ;;  %s421_s0 = smov [#allocation5]  }
  0x14   :  { %v25_v2 = vld [vmem:[#allocation2 + $0x10] sm:$0xff]  ;;  %v26_v3 = vld [vmem:[#allocation2 + $0x18] sm:$0xff]  ;;  %v39_v4 = vmul.f32 0.5, %v23_v0  ;;  %v27_v5 = vld [vmem:[#allocation2 + $0x20] sm:$0xff]  ;;  %v40_v6 = vmul.f32 0.5, %v24_v1  ;;  %s291_s20 = sshll.u32 %s421_s0, 4  ;;  %s292_s20 = int_to_ptr.vmem [resolvable:$true] %s291_s20 }
  0x15   :  { %v28_v7 = vld [vmem:[#allocation2 + $0x28] sm:$0xff]  ;;  %v41_v8 = vmul.f32 0.5, %v25_v2  ;;  %v29_v9 = vld [vmem:[#allocation2 + $0x30] sm:$0xff]  ;;  %v42_v10 = vmul.f32 0.5, %v26_v3  ;;  %v30_v11 = vld [vmem:[#allocation2 + $0x38] sm:$0xff]  ;;  %v43_v12 = vmul.f32 0.5, %v27_v5  ;;  %p396_p9 = scmp.lt.s32.totalorder %s292_s20, %s292_s20 }
  0x16   :  { %305 = vtanh.f32 %v39_v4  ;;  %v31_v13 = vld [vmem:[#allocation2 + $0x40] sm:$0xff]  ;;  %v44_v14 = vmul.f32 0.5, %v28_v7  ;;  %v32_v15 = vld [vmem:[#allocation2 + $0x48] sm:$0xff]  ;;  %v45_v16 = vmul.f32 0.5, %v29_v9  ;;  %v33_v17 = vld [vmem:[#allocation2 + $0x50] sm:$0xff]  ;;  %v46_v18 = vmul.f32 0.5, %v30_v11 }
  0x17   :  { %307 = vtanh.f32 %v40_v6  ;;  %v34_v19 = vld [vmem:[#allocation2 + $0x58] sm:$0xff]  ;;  %v47_v20 = vmul.f32 0.5, %v31_v13  ;;  %v35_v21 = vld [vmem:[#allocation2 + $0x60] sm:$0xff]  ;;  %v48_v22 = vmul.f32 0.5, %v32_v15  ;;  %v36_v23 = vld [vmem:[#allocation2 + $0x68] sm:$0xff]  ;;  %v49_v24 = vmul.f32 0.5, %v33_v17 }
  0x18   :  { %309 = vtanh.f32 %v41_v8  ;;  %v37_v25 = vld [vmem:[#allocation2 + $0x70] sm:$0xff]  ;;  %v50_v26 = vmul.f32 0.5, %v34_v19  ;;  %v38_v27 = vld [vmem:[#allocation2 + $0x78] sm:$0xff]  ;;  %v51_v28 = vmul.f32 0.5, %v35_v21  ;;  %v52_v29 = vmul.f32 0.5, %v36_v23  ;;  %s391_s21 = scalar_lea.vmem %s292_s20, 64 }
  0x19   :  { %311 = vtanh.f32 %v42_v10  ;;  %v53_v31 = vmul.f32 0.5, %v37_v25  ;;  %v54_v33 = vmul.f32 0.5, %v38_v27  ;;  %p392_p8 = scmp.ne.s32.totalorder %s292_s20, %s391_s21  ;;  %p397_p10 = scmp.lt.s32.totalorder %s391_s21, %s391_s21 }
  0x1a   :  { %313 = vtanh.f32 %v43_v12 }
  0x1b   :  { %315 = vtanh.f32 %v44_v14  ;;  %p398_p11 = por %p397_p10, %p396_p9 }
  0x1c   :  { %317 = vtanh.f32 %v45_v16 }
  0x1d   :  { %319 = vtanh.f32 %v46_v18  ;;  %p399_p12 = pnand %p398_p11, %p392_p8 }
  0x1e   :  { %321 = vtanh.f32 %v47_v20 }
  0x1f   :  { %323 = vtanh.f32 %v48_v22 }
  0x20   :  { %v306_v30 = vpop.eup %305  ;;  %325 = vtanh.f32 %v49_v24 }
  0x21   :  { %v308_v32 = vpop.eup %307  ;;  %327 = vtanh.f32 %v50_v26  ;;  %v71_v36 = vmul.f32 0.5, %v306_v30 }
  0x22   :  { %v310_v34 = vpop.eup %309  ;;  %329 = vtanh.f32 %v51_v28  ;;  %v72_v38 = vmul.f32 0.5, %v308_v32 }
  0x23   :  { %v312_v35 = vpop.eup %311  ;;  %331 = vtanh.f32 %v52_v29  ;;  %v73_v40 = vmul.f32 0.5, %v310_v34  ;;  %v444_v45 = vadd.f32 0.5, %v71_v36 }
  0x24   :  { %v314_v37 = vpop.eup %313  ;;  %333 = vtanh.f32 %v53_v31  ;;  %v74_v42 = vmul.f32 0.5, %v312_v35  ;;  %v446_v48 = vadd.f32 0.5, %v72_v38 }
  0x25   :  { %v316_v39 = vpop.eup %315  ;;  %335 = vtanh.f32 %v54_v33  ;;  %v75_v44 = vmul.f32 0.5, %v314_v37  ;;  %v448_v51 = vadd.f32 0.5, %v73_v40  ;;  %v119_v58 = vsub.f32 1.0, %v444_v45 }
  0x26   :  { %v318_v41 = vpop.eup %317  ;;  %v76_v47 = vmul.f32 0.5, %v316_v39  ;;  %v450_v54 = vadd.f32 0.5, %v74_v42  ;;  %v120_v62 = vsub.f32 1.0, %v446_v48 }
  0x27   :  { %v320_v43 = vpop.eup %319  ;;  %v77_v50 = vmul.f32 0.5, %v318_v41  ;;  %v452_v57 = vadd.f32 0.5, %v75_v44  ;;  %v121_v2 = vsub.f32 1.0, %v448_v51  ;;  %v135_v11 = vadd.f32 1e-12, %v119_v58 }
  0x28   :  { %v322_v46 = vpop.eup %321  ;;  %v78_v53 = vmul.f32 0.5, %v320_v43  ;;  %v455_v61 = vadd.f32 0.5, %v76_v47  ;;  %v122_v6 = vsub.f32 1.0, %v450_v54  ;;  %v136_v15 = vadd.f32 1e-12, %v120_v62 }
  0x29   :  { %v324_v49 = vpop.eup %323  ;;  %v79_v56 = vmul.f32 0.5, %v322_v46  ;;  %v458_v1 = vadd.f32 0.5, %v77_v50  ;;  %v123_v10 = vsub.f32 1.0, %v452_v57  ;;  %v137_v19 = vadd.f32 1e-12, %v121_v2 }
  0x2a   :  { %v326_v52 = vpop.eup %325  ;;  %v80_v60 = vmul.f32 0.5, %v324_v49  ;;  %v461_v5 = vadd.f32 0.5, %v78_v53  ;;  %v124_v14 = vsub.f32 1.0, %v455_v61  ;;  %v138_v23 = vadd.f32 1e-12, %v122_v6 }
  0x2b   :  { %v328_v55 = vpop.eup %327  ;;  %v81_v0 = vmul.f32 0.5, %v326_v52  ;;  %v464_v9 = vadd.f32 0.5, %v79_v56  ;;  %v125_v18 = vsub.f32 1.0, %v458_v1  ;;  %v139_v26 = vadd.f32 1e-12, %v123_v10 }
  0x2c   :  { %v330_v59 = vpop.eup %329  ;;  %v82_v4 = vmul.f32 0.5, %v328_v55  ;;  %v467_v13 = vadd.f32 0.5, %v80_v60  ;;  %v126_v22 = vsub.f32 1.0, %v461_v5  ;;  %v151_v27 = vmin.f32 %v135_v11, 1.0 }
  0x2d   :  { %v332_v63 = vpop.eup %331  ;;  %v83_v8 = vmul.f32 0.5, %v330_v59  ;;  %v470_v17 = vadd.f32 0.5, %v81_v0  ;;  %v127_v25 = vsub.f32 1.0, %v464_v9  ;;  %v140_v30 = vadd.f32 1e-12, %v124_v14 }
  0x2e   :  { %v334_v3 = vpop.eup %333  ;;  %v84_v12 = vmul.f32 0.5, %v332_v63  ;;  %v473_v21 = vadd.f32 0.5, %v82_v4  ;;  %v128_v29 = vsub.f32 1.0, %v467_v13  ;;  %v152_v31 = vmin.f32 %v136_v15, 1.0 }
  0x2f   :  { %v336_v7 = vpop.eup %335  ;;  %v85_v16 = vmul.f32 0.5, %v334_v3  ;;  %v476_v24 = vadd.f32 0.5, %v83_v8  ;;  %v129_v33 = vsub.f32 1.0, %v470_v17  ;;  %v141_v34 = vadd.f32 1e-12, %v125_v18 }
  0x30   :  { %v86_v20 = vmul.f32 0.5, %v336_v7  ;;  %v479_v28 = vadd.f32 0.5, %v84_v12  ;;  %v153_v35 = vmin.f32 %v137_v19, 1.0  ;;  %v130_v37 = vsub.f32 1.0, %v473_v21 }
  0x31   :  { %v482_v32 = vadd.f32 0.5, %v85_v16  ;;  %v142_v38 = vadd.f32 1e-12, %v126_v22  ;;  %v154_v39 = vmin.f32 %v138_v23, 1.0  ;;  %v131_v40 = vsub.f32 1.0, %v476_v24 }
  0x32   :  { %v485_v36 = vadd.f32 0.5, %v86_v20  ;;  %v143_v41 = vadd.f32 1e-12, %v127_v25  ;;  %v155_v42 = vmin.f32 %v139_v26, 1.0  ;;  %337 = vlog2.f32 %v151_v27 }
  0x33   :  { %v132_v43 = vsub.f32 1.0, %v479_v28  ;;  %v144_v44 = vadd.f32 1e-12, %v128_v29  ;;  %v156_v46 = vmin.f32 %v140_v30, 1.0  ;;  %339 = vlog2.f32 %v152_v31 }
  0x34   :  { %v133_v47 = vsub.f32 1.0, %v482_v32  ;;  %v145_v49 = vadd.f32 1e-12, %v129_v33  ;;  %v157_v50 = vmin.f32 %v141_v34, 1.0  ;;  %341 = vlog2.f32 %v153_v35 }
  0x35   :  { %v134_v52 = vsub.f32 1.0, %v485_v36  ;;  %v146_v53 = vadd.f32 1e-12, %v130_v37  ;;  %v158_v55 = vmin.f32 %v142_v38, 1.0  ;;  %343 = vlog2.f32 %v154_v39 }
  0x36   :  { %v147_v56 = vadd.f32 1e-12, %v131_v40  ;;  %v159_v58 = vmin.f32 %v143_v41, 1.0  ;;  %345 = vlog2.f32 %v155_v42  ;;  %v148_v59 = vadd.f32 1e-12, %v132_v43 }
  0x37   :  { %v160_v60 = vmin.f32 %v144_v44, 1.0  ;;  %347 = vlog2.f32 %v156_v46  ;;  %v149_v62 = vadd.f32 1e-12, %v133_v47  ;;  %v161_v63 = vmin.f32 %v145_v49, 1.0 }
  0x38   :  { %349 = vlog2.f32 %v157_v50  ;;  %v150_v0 = vadd.f32 1e-12, %v134_v52  ;;  %v162_v2 = vmin.f32 %v146_v53, 1.0  ;;  %v163_v3 = vmin.f32 %v147_v56, 1.0 }
  0x39   :  { %351 = vlog2.f32 %v158_v55  ;;  %v164_v4 = vmin.f32 %v148_v59, 1.0  ;;  %v165_v7 = vmin.f32 %v149_v62, 1.0  ;;  %v103_v10 = vmul.f32 %v444_v45, %v444_v45 }
  0x3a   :  { %353 = vlog2.f32 %v159_v58  ;;  %v166_v11 = vmin.f32 %v150_v0, 1.0  ;;  %v104_v15 = vmul.f32 %v446_v48, %v446_v48  ;;  %v105_v19 = vmul.f32 %v448_v51, %v448_v51 }
  0x3b   :  { %355 = vlog2.f32 %v160_v60  ;;  %v107_v20 = vmul.f32 %v452_v57, %v452_v57  ;;  %v106_v45 = vmul.f32 %v450_v54, %v450_v54  ;;  %v108_v25 = vmul.f32 %v455_v61, %v455_v61 }
  0x3c   :  { %v338_v6 = vpop.eup %337  ;;  %357 = vlog2.f32 %v161_v63  ;;  %v109_v27 = vmul.f32 %v458_v1, %v458_v1  ;;  %v110_v57 = vmul.f32 %v461_v5, %v461_v5  ;;  %v111_v54 = vmul.f32 %v464_v9, %v464_v9 }
  0x3d   :  { %v340_v8 = vpop.eup %339  ;;  %v168_v12 = vmul.f32 0.6931472, %v338_v6  ;;  %359 = vlog2.f32 %v162_v2  ;;  %v112_v1 = vmul.f32 %v467_v13, %v467_v13  ;;  %v113_v5 = vmul.f32 %v470_v17, %v470_v17 }
  0x3e   :  { %v342_v14 = vpop.eup %341  ;;  %v170_v16 = vmul.f32 0.6931472, %v340_v8  ;;  %361 = vlog2.f32 %v163_v3  ;;  %v114_v9 = vmul.f32 %v473_v21, %v473_v21  ;;  %v115_v13 = vmul.f32 %v476_v24, %v476_v24 }
  0x3f   :  { %v344_v18 = vpop.eup %343  ;;  %v172_v22 = vmul.f32 0.6931472, %v342_v14  ;;  %363 = vlog2.f32 %v164_v4  ;;  %v199_v51 = vmul.f32 %v168_v12, %v103_v10  ;;  %v116_v17 = vmul.f32 %v479_v28, %v479_v28 }
  0x40   :  { %v346_v23 = vpop.eup %345  ;;  %v174_v26 = vmul.f32 0.6931472, %v344_v18  ;;  %365 = vlog2.f32 %v165_v7  ;;  %v200_v33 = vmul.f32 %v170_v16, %v104_v15  ;;  %v117_v21 = vmul.f32 %v482_v32, %v482_v32 }
  0x41   :  { %v348_v48 = vpop.eup %347  ;;  %v176_v29 = vmul.f32 0.6931472, %v346_v23  ;;  %367 = vlog2.f32 %v166_v11  ;;  %v201_v35 = vmul.f32 %v172_v22, %v105_v19  ;;  %v118_v24 = vmul.f32 %v485_v36, %v485_v36 }
  0x42   :  { %v350_v30 = vpop.eup %349  ;;  %v178_v31 = vmul.f32 0.6931472, %v348_v48  ;;  %v202_v40 = vmul.f32 %v174_v26, %v106_v45 }
  0x43   :  { %v352_v34 = vpop.eup %351  ;;  %v180_v61 = vmul.f32 0.6931472, %v350_v30  ;;  %v203_v37 = vmul.f32 %v176_v29, %v107_v20 }
  0x44   :  { %v354_v38 = vpop.eup %353  ;;  %v182_v39 = vmul.f32 0.6931472, %v352_v34  ;;  %v204_v41 = vmul.f32 %v178_v31, %v108_v25 }
  0x45   :  { %v356_v42 = vpop.eup %355  ;;  %v184_v43 = vmul.f32 0.6931472, %v354_v38  ;;  %v205_v44 = vmul.f32 %v180_v61, %v109_v27  ;;  %v215_v46 = vadd.f32 %v203_v37, %v199_v51  ;;  %v420_v51 = vmov 1966171168  }
  0x46   :  { %v358_v47 = vpop.eup %357  ;;  %v186_v49 = vmul.f32 0.6931472, %v356_v42  ;;  %v206_v50 = vmul.f32 %v182_v39, %v110_v57  ;;  %v224_v52 = vadd.f32 %v204_v41, %v200_v33  ;;  %v258_v30 = vunpack.c.l.s4 %v420_v51 }
  0x47   :  { %v360_v53 = vpop.eup %359  ;;  %v188_v55 = vmul.f32 0.6931472, %v358_v47  ;;  %v207_v56 = vmul.f32 %v184_v43, %v111_v54  ;;  %v233_v58 = vadd.f32 %v205_v44, %v201_v35  ;;  %v260_v57 = vlaneseq }
  0x48   :  { %v362_v59 = vpop.eup %361  ;;  %v190_v60 = vmul.f32 0.6931472, %v360_v53  ;;  %v208_v62 = vmul.f32 %v186_v49, %v112_v1  ;;  %v242_v63 = vadd.f32 %v206_v50, %v202_v40  ;;  %v259_v1 = vunpack.c.0.s8 %v258_v30 }
  0x49   :  { %v364_v0 = vpop.eup %363  ;;  %v192_v2 = vmul.f32 0.6931472, %v362_v59  ;;  %v209_v3 = vmul.f32 %v188_v55, %v113_v5  ;;  %v216_v4 = vadd.f32 %v215_v46, %v207_v56  ;;  %v261_v39 = vshrl.u32 %v260_v57, 7 }
  0x4a   :  { %v366_v6 = vpop.eup %365  ;;  %v194_v7 = vmul.f32 0.6931472, %v364_v0  ;;  %v210_v8 = vmul.f32 %v190_v60, %v114_v9  ;;  %v225_v10 = vadd.f32 %v224_v52, %v208_v62  ;;  %vm282_vm0 = vcmp.lt.s32.totalorder %v260_v57, 512 }
  0x4b   :  { %v368_v11 = vpop.eup %367  ;;  %v196_v12 = vmul.f32 0.6931472, %v366_v6  ;;  %v211_v28 = vmul.f32 %v192_v2, %v115_v13  ;;  %v234_v14 = vadd.f32 %v233_v58, %v209_v3  ;;  %v262_v9 = vsub.s32 %v259_v1, %v261_v39 }
  0x4c   :  { %v198_v15 = vmul.f32 0.6931472, %v368_v11  ;;  %v212_v16 = vmul.f32 %v194_v7, %v116_v17  ;;  %v243_v18 = vadd.f32 %v242_v63, %v210_v8 }
  0x4d   :  { %v213_v19 = vmul.f32 %v196_v12, %v117_v21  ;;  %v217_v20 = vadd.f32 %v216_v4, %v211_v28 }
  0x4e   :  { %v214_v32 = vmul.f32 %v198_v15, %v118_v24  ;;  %v226_v22 = vadd.f32 %v225_v10, %v212_v16 }
  0x4f   :  { %v218_v23 = vrot.slane %v217_v20, 4  ;;  %v235_v45 = vadd.f32 %v234_v14, %v213_v19 }
  0x50   :  { %v227_v25 = vrot.slane %v226_v22, 4  ;;  %v244_v26 = vadd.f32 %v243_v18, %v214_v32 }
  0x51   :  { %v219_v48 = vadd.f32 %v218_v23, %v217_v20  ;;  %v236_v36 = vrot.slane %v235_v45, 4 }
  0x52   :  { %v228_v27 = vadd.f32 %v227_v25, %v226_v22  ;;  %v245_v29 = vrot.slane %v244_v26, 4 }
  0x53   :  { %v220_v31 = vrot.slane %v219_v48, 2  ;;  %v237_v33 = vadd.f32 %v236_v36, %v235_v45 }
  0x54   :  { %v229_v34 = vrot.slane %v228_v27, 2  ;;  %v246_v54 = vadd.f32 %v245_v29, %v244_v26 }
  0x55   :  { %v221_v61 = vadd.f32 %v220_v31, %v219_v48  ;;  %v238_v35 = vrot.slane %v237_v33, 2 }
  0x56   :  { %v230_v37 = vadd.f32 %v229_v34, %v228_v27  ;;  %v247_v38 = vrot.slane %v246_v54, 2 }
  0x57   :  { %v222_v40 = vrot.slane %v221_v61, 1  ;;  %v239_v41 = vadd.f32 %v238_v35, %v237_v33 }
  0x58   :  { %v231_v42 = vrot.slane %v230_v37, 1  ;;  %v248_v5 = vadd.f32 %v247_v38, %v246_v54 }
  0x59   :  { %v223_v43 = vadd.f32 %v222_v40, %v221_v61  ;;  %v240_v44 = vrot.slane %v239_v41, 1 }
  0x5a   :  { %v232_v46 = vadd.f32 %v231_v42, %v230_v37  ;;  %v249_v47 = vrot.slane %v248_v5, 1 }
  0x5b   :  { %v241_v49 = vadd.f32 %v240_v44, %v239_v41 }
  0x5c   :  { %v250_v50 = vadd.f32 %v249_v47, %v248_v5  ;;  %v255_v52 = vcombine.low %v223_v43, %v232_v46 }
  0x5e   :  { %v256_v53 = vcombine.low %v241_v49, %v250_v50  ;;  %v263_v13 = vrot.slane %v255_v52, %v262_v9 }
  0x60   :  { %v270_v55 = vrot.slane %v256_v53, %v262_v9 }
  0x62   :  { %v271_v56 = vcombine.low %v263_v13, %v270_v55 }
  0x64   :  { %v278_v58 = vrot.slane %v271_v56, %v262_v9 }
  0x66   :  { %284 = vst.msk [vmem:[#allocation5] sm:$0xf] %vm282_vm0, %v278_v58 }
  0x67   :  { %402 = shalt.err (!%p399_p12)
}
  0x68   :  { %s403_s24 = scalar_lea.hbm %s537_s1, 64 }
  0x69   :  { %p404_p13 = scmp.ne.s32.totalorder %s537_s1, %s403_s24  ;;  %p407_p0 = scmp.lt.u32.totalorder %s403_s24, %s537_s1 }
  0x6b   :  { %p409_p1 = pnand %p407_p0, %p404_p13 }
  0x6d   :  { %412 = shalt.err (!%p409_p1)
}
  0x6e   :  { %294 = dma.vmem_to_hbm [thread:$0]  %s292_s20, 64, %s537_s1, [#allocation4]  }
  0x6f   :  { %415 = dma.done.wait [#allocation4], 64  }
  0x70   :  { %416 = vsyncadd [#allocation4], 4294967232 }
  0x71   :  { %298 = vsyncpa [#allocation3], 1 }
  0x72   :  { %299 = vsyncpa [#allocation4], 1 }

</bundles_post_ra>
